<compile_context>
chip_gen: v5e
topology: v5e:2x2
jax: 0.10.0
libtpu: 0.0.40
codegen_flags: <defaults>
</compile_context>

<pallas_src>
import functools

import jax
import jax.numpy as jnp
from jax.experimental import pallas as pl
from jax.experimental.pallas import tpu as pltpu

N_EMBED = 128
HIDDEN = 4 * N_EMBED          # 512
DROPOUT_P = 0.3
DEFAULT_TM = 512              # row tile; sweep 256/512/1024 on large inputs


def _round_up(n, m):
    return ((n + m - 1) // m) * m


def _ffn_compute(x_ref, w1_ref, b1_ref, w2_ref, b2_ref):
    # x_ref: (tm, d) bf16; w1: (d, h) bf16; w2: (h, d) bf16; biases f32.
    # bf16 MXU inputs, f32 accumulation; bias/ReLU in f32.
    h = jnp.dot(x_ref[...], w1_ref[...], preferred_element_type=jnp.float32)
    h = jnp.maximum(h + b1_ref[...], 0.0)
    out = jnp.dot(h.astype(jnp.bfloat16), w2_ref[...],
                  preferred_element_type=jnp.float32) + b2_ref[...]
    return out


def _ffn_eval_kernel(x_ref, w1_ref, b1_ref, w2_ref, b2_ref, o_ref):
    o_ref[...] = _ffn_compute(x_ref, w1_ref, b1_ref, w2_ref, b2_ref).astype(o_ref.dtype)


def _ffn_train_kernel(seed_ref, x_ref, w1_ref, b1_ref, w2_ref, b2_ref, o_ref, *, p):
    out = _ffn_compute(x_ref, w1_ref, b1_ref, w2_ref, b2_ref)
    # Inverted dropout with the hardware PRNG; distinct stream per row tile.
    pltpu.prng_seed(seed_ref[0] + pl.program_id(0))
    bits = pltpu.prng_random_bits(out.shape)
    if bits.dtype != jnp.uint32:            # some JAX versions return raw int32 bits
        bits = pltpu.bitcast(bits, jnp.uint32)
    keep = bits >= jnp.uint32(int(p * (2 ** 32)))
    out = jnp.where(keep, out * (1.0 / (1.0 - p)), 0.0)
    o_ref[...] = out.astype(o_ref.dtype)


def feed_forward(x, w1, b1, w2, b2, *, training=False, seed=0, tm=DEFAULT_TM):
    """x: (..., n_embed). Weights stored as (in, out), i.e. y = x @ W + b."""
    orig_shape = x.shape
    d = orig_shape[-1]
    hidden = w1.shape[1]
    out_dtype = x.dtype

    xf = x.reshape(-1, d)
    rows = xf.shape[0]

    # Row tile: at most `tm`, a multiple of 8 (sublane), shrunk for tiny inputs.
    tm_eff = min(tm, _round_up(rows, 8))
    padded_rows = _round_up(rows, tm_eff)
    if padded_rows != rows:
        xf = jnp.pad(xf, ((0, padded_rows - rows), (0, 0)))
    grid = (padded_rows // tm_eff,)

    # bf16 MXU operands (halves x/weight DMA bytes); biases stay f32.
    x_bf = xf.astype(jnp.bfloat16)
    w1_bf = w1.astype(jnp.bfloat16)
    w2_bf = w2.astype(jnp.bfloat16)
    b1_2d = b1.reshape(1, hidden).astype(jnp.float32)
    b2_2d = b2.reshape(1, d).astype(jnp.float32)

    cost = pl.CostEstimate(
        flops=2 * padded_rows * (d * hidden + hidden * d),
        transcendentals=0,
        bytes_accessed=(x_bf.size * 2 + padded_rows * d * 4
                        + (w1_bf.size + w2_bf.size) * 2
                        + (b1_2d.size + b2_2d.size) * 4),
    )
    compiler_params = pltpu.CompilerParams(dimension_semantics=("parallel",))
    out_shape = jax.ShapeDtypeStruct((padded_rows, d), out_dtype)
    # NOTE: VMEM use at tm=512 is ~2 MiB total, well inside every generation's
    # default scoped limit; only raise vmem_limit_bytes if tm >= ~2048 (v5e).

    def _call(weight_mode):
        def wspec(shape, index_map):
            if weight_mode is None:
                return pl.BlockSpec(shape, index_map)
            return pl.BlockSpec(shape, index_map, pipeline_mode=weight_mode)

        if training:
            seed_arr = jnp.array([seed], dtype=jnp.int32)
            kernel = functools.partial(_ffn_train_kernel, p=DROPOUT_P)
            grid_spec = pltpu.PrefetchScalarGridSpec(
                num_scalar_prefetch=1,
                grid=grid,
                in_specs=[
                    pl.BlockSpec((tm_eff, d), lambda i, s: (i, 0)),      # x tile
                    wspec((d, hidden), lambda i, s: (0, 0)),             # W1 resident
                    wspec((1, hidden), lambda i, s: (0, 0)),             # b1
                    wspec((hidden, d), lambda i, s: (0, 0)),             # W2 resident
                    wspec((1, d), lambda i, s: (0, 0)),                  # b2
                ],
                out_specs=pl.BlockSpec((tm_eff, d), lambda i, s: (i, 0)),
            )
            return pl.pallas_call(
                kernel, out_shape=out_shape, grid_spec=grid_spec,
                compiler_params=compiler_params, cost_estimate=cost,
            )(seed_arr, x_bf, w1_bf, b1_2d, w2_bf, b2_2d)
        else:
            grid_spec = pl.GridSpec(
                grid=grid,
                in_specs=[
                    pl.BlockSpec((tm_eff, d), lambda i: (i, 0)),         # x tile
                    wspec((d, hidden), lambda i: (0, 0)),                # W1 resident
                    wspec((1, hidden), lambda i: (0, 0)),                # b1
                    wspec((hidden, d), lambda i: (0, 0)),                # W2 resident
                    wspec((1, d), lambda i: (0, 0)),                     # b2
                ],
                out_specs=pl.BlockSpec((tm_eff, d), lambda i: (i, 0)),
            )
            return pl.pallas_call(
                _ffn_eval_kernel, out_shape=out_shape, grid_spec=grid_spec,
                compiler_params=compiler_params, cost_estimate=cost,
            )(x_bf, w1_bf, b1_2d, w2_bf, b2_2d)

    try:
        # Grid-invariant weights/biases: single-buffered (constant index_map,
        # never re-DMA'd) -> frees VMEM headroom for larger row tiles.
        out = _call(pl.Buffered(1))
    except Exception:  # fallback if pipeline_mode is unsupported in this JAX
        out = _call(None)

    if padded_rows != rows:
        out = out[:rows]
    return out.reshape(orig_shape)


def init_params(key, n_embed=N_EMBED):
    """Deterministic init matching nn.Linear shapes (stored transposed as (in, out))."""
    k1, k2, k3, k4 = jax.random.split(key, 4)
    hidden = 4 * n_embed
    bound1 = 1.0 / jnp.sqrt(n_embed)
    bound2 = 1.0 / jnp.sqrt(hidden)
    w1 = jax.random.uniform(k1, (n_embed, hidden), jnp.float32, -bound1, bound1)
    b1 = jax.random.uniform(k2, (hidden,), jnp.float32, -bound1, bound1)
    w2 = jax.random.uniform(k3, (hidden, n_embed), jnp.float32, -bound2, bound2)
    b2 = jax.random.uniform(k4, (n_embed,), jnp.float32, -bound2, bound2)
    return w1, b1, w2, b2


if __name__ == "__main__":
    key = jax.random.PRNGKey(0)
    kx, kp, kx2 = jax.random.split(key, 3)

    w1, b1, w2, b2 = init_params(kp)

    def reference(x):
        # bf16-input / f32-accumulate reference matching the kernel's MXU math.
        xb = x.reshape(-1, N_EMBED).astype(jnp.bfloat16)
        h = jnp.dot(xb, w1.astype(jnp.bfloat16),
                    preferred_element_type=jnp.float32) + b1
        h = jnp.maximum(h, 0.0)
        o = jnp.dot(h.astype(jnp.bfloat16), w2.astype(jnp.bfloat16),
                    preferred_element_type=jnp.float32) + b2
        return o.reshape(x.shape)

    # Small shape implied by the module (batch=2, seq=8, n_embed=128).
    x = jax.random.normal(kx, (2, 8, N_EMBED), dtype=jnp.float32)
    out = jax.block_until_ready(feed_forward(x, w1, b1, w2, b2, training=False))
    assert out.shape == x.shape and out.dtype == x.dtype
    assert jnp.allclose(out, reference(x), atol=1e-2, rtol=1e-2)

    # Second shape exercising row padding + a multi-step grid (rows=300).
    x2 = jax.random.normal(kx2, (3, 100, N_EMBED), dtype=jnp.float32)
    out2 = jax.block_until_ready(feed_forward(x2, w1, b1, w2, b2, training=False, tm=256))
    assert out2.shape == x2.shape
    assert jnp.allclose(out2, reference(x2), atol=1e-2, rtol=1e-2)

    print("KERNEL_OK")
</pallas_src>

<mosaic_0001>
module attributes {stable_mosaic.version = 11 : i64} {
  func.func @_ffn_eval_kernel(%arg0: i32, %arg1: memref<16x128xbf16, #tpu.memory_space<vmem>>, %arg2: memref<128x512xbf16, #tpu.memory_space<vmem>>, %arg3: memref<1x512xf32, #tpu.memory_space<vmem>>, %arg4: memref<512x128xbf16, #tpu.memory_space<vmem>>, %arg5: memref<1x128xf32, #tpu.memory_space<vmem>>, %arg6: memref<16x128xf32, #tpu.memory_space<vmem>>) attributes {dimension_semantics = [#tpu.dimension_semantics<parallel>], iteration_bounds = array<i64: 1>, scalar_prefetch = 0 : i64, scratch_operands = 0 : i64, tpu.core_type = #tpu.core_type<tc>, window_params = [{transform_indices = @transform_0, window_bounds = array<i64: 16, 128>}, {pipeline_mode = #tpu.pipeline_mode<synchronous>, transform_indices = @transform_1, window_bounds = array<i64: 128, 512>}, {pipeline_mode = #tpu.pipeline_mode<synchronous>, transform_indices = @transform_2, window_bounds = array<i64: 1, 512>}, {pipeline_mode = #tpu.pipeline_mode<synchronous>, transform_indices = @transform_3, window_bounds = array<i64: 512, 128>}, {pipeline_mode = #tpu.pipeline_mode<synchronous>, transform_indices = @transform_4, window_bounds = array<i64: 1, 128>}, {transform_indices = @transform_5, window_bounds = array<i64: 16, 128>}]} {
    %c0 = arith.constant 0 : index
    %c0_0 = arith.constant 0 : index
    %0 = vector.load %arg1[%c0, %c0_0] : memref<16x128xbf16, #tpu.memory_space<vmem>>, vector<16x128xbf16>
    %c0_1 = arith.constant 0 : index
    %c0_2 = arith.constant 0 : index
    %1 = vector.load %arg2[%c0_1, %c0_2] : memref<128x512xbf16, #tpu.memory_space<vmem>>, vector<128x512xbf16>
    %cst = arith.constant dense<0.000000e+00> : vector<16x512xf32>
    %2 = tpu.matmul %0, %1, %cst {dimension_numbers = #tpu.dot_dimension_numbers<[1], [0], [0], [1], [0, 0, 1, 1], [], []>} : vector<16x128xbf16>, vector<128x512xbf16>, vector<16x512xf32> -> vector<16x512xf32>
    %c0_3 = arith.constant 0 : index
    %c0_4 = arith.constant 0 : index
    %3 = vector.load %arg3[%c0_3, %c0_4] : memref<1x512xf32, #tpu.memory_space<vmem>>, vector<1x512xf32>
    %4 = vector.broadcast %3 : vector<1x512xf32> to vector<16x512xf32>
    %5 = arith.addf %2, %4 : vector<16x512xf32>
    %cst_5 = arith.constant 0.000000e+00 : f32
    %6 = vector.broadcast %cst_5 : f32 to vector<16x512xf32>
    %7 = arith.maximumf %5, %6 : vector<16x512xf32>
    %8 = arith.truncf %7 : vector<16x512xf32> to vector<16x512xbf16>
    %c0_6 = arith.constant 0 : index
    %c0_7 = arith.constant 0 : index
    %9 = vector.load %arg4[%c0_6, %c0_7] : memref<512x128xbf16, #tpu.memory_space<vmem>>, vector<512x128xbf16>
    %cst_8 = arith.constant dense<0.000000e+00> : vector<16x128xf32>
    %10 = tpu.matmul %8, %9, %cst_8 {dimension_numbers = #tpu.dot_dimension_numbers<[1], [0], [0], [1], [0, 0, 1, 1], [], []>} : vector<16x512xbf16>, vector<512x128xbf16>, vector<16x128xf32> -> vector<16x128xf32>
    %c0_9 = arith.constant 0 : index
    %c0_10 = arith.constant 0 : index
    %11 = vector.load %arg5[%c0_9, %c0_10] : memref<1x128xf32, #tpu.memory_space<vmem>>, vector<1x128xf32>
    %12 = vector.broadcast %11 : vector<1x128xf32> to vector<16x128xf32>
    %13 = arith.addf %10, %12 : vector<16x128xf32>
    %c0_11 = arith.constant 0 : index
    %c0_12 = arith.constant 0 : index
    %14 = vector.load %arg6[%c0_11, %c0_12] : memref<16x128xf32, #tpu.memory_space<vmem>>, vector<16x128xf32>
    tpu.vector_store %arg6[%c0_11, %c0_12], %13 {strides = array<i32>} : memref<16x128xf32, #tpu.memory_space<vmem>>, vector<16x128xf32>,
    return
  }
  func.func @transform_0(%arg0: i32) -> (i32, i32) {
    %c0_i32 = arith.constant 0 : i32
    %c0_i32_0 = arith.constant 0 : i32
    return %arg0, %c0_i32 : i32, i32
  }
  func.func @transform_1(%arg0: i32) -> (i32, i32) {
    %c0_i32 = arith.constant 0 : i32
    %c0_i32_0 = arith.constant 0 : i32
    %c0_i32_1 = arith.constant 0 : i32
    return %c0_i32, %c0_i32_0 : i32, i32
  }
  func.func @transform_2(%arg0: i32) -> (i32, i32) {
    %c0_i32 = arith.constant 0 : i32
    %c0_i32_0 = arith.constant 0 : i32
    %c0_i32_1 = arith.constant 0 : i32
    return %c0_i32, %c0_i32_0 : i32, i32
  }
  func.func @transform_3(%arg0: i32) -> (i32, i32) {
    %c0_i32 = arith.constant 0 : i32
    %c0_i32_0 = arith.constant 0 : i32
    %c0_i32_1 = arith.constant 0 : i32
    return %c0_i32, %c0_i32_0 : i32, i32
  }
  func.func @transform_4(%arg0: i32) -> (i32, i32) {
    %c0_i32 = arith.constant 0 : i32
    %c0_i32_0 = arith.constant 0 : i32
    %c0_i32_1 = arith.constant 0 : i32
    return %c0_i32, %c0_i32_0 : i32, i32
  }
  func.func @transform_5(%arg0: i32) -> (i32, i32) {
    %c0_i32 = arith.constant 0 : i32
    %c0_i32_0 = arith.constant 0 : i32
    return %arg0, %c0_i32 : i32, i32
  }
}

module attributes {stable_mosaic.version = 11 : i64} {
  func.func @_ffn_eval_kernel(%arg0: i32, %arg1: memref<16x128xbf16, #tpu.memory_space<vmem>>, %arg2: memref<128x512xbf16, #tpu.memory_space<vmem>>, %arg3: memref<1x512xf32, #tpu.memory_space<vmem>>, %arg4: memref<512x128xbf16, #tpu.memory_space<vmem>>, %arg5: memref<1x128xf32, #tpu.memory_space<vmem>>, %arg6: memref<16x128xf32, #tpu.memory_space<vmem>>) attributes {dimension_semantics = [#tpu.dimension_semantics<parallel>], iteration_bounds = array<i64: 1>, scalar_prefetch = 0 : i64, scratch_operands = 0 : i64, tpu.core_type = #tpu.core_type<tc>, window_params = [{transform_indices = @transform_0, window_bounds = array<i64: 16, 128>}, {pipeline_mode = #tpu.pipeline_mode<synchronous>, transform_indices = @transform_1, window_bounds = array<i64: 128, 512>}, {pipeline_mode = #tpu.pipeline_mode<synchronous>, transform_indices = @transform_2, window_bounds = array<i64: 1, 512>}, {pipeline_mode = #tpu.pipeline_mode<synchronous>, transform_indices = @transform_3, window_bounds = array<i64: 512, 128>}, {pipeline_mode = #tpu.pipeline_mode<synchronous>, transform_indices = @transform_4, window_bounds = array<i64: 1, 128>}, {transform_indices = @transform_5, window_bounds = array<i64: 16, 128>}]} {
    %c0 = arith.constant 0 : index
    %c0_0 = arith.constant 0 : index
    %0 = vector.load %arg1[%c0, %c0_0] : memref<16x128xbf16, #tpu.memory_space<vmem>>, vector<16x128xbf16>
    %c0_1 = arith.constant 0 : index
    %c0_2 = arith.constant 0 : index
    %1 = vector.load %arg2[%c0_1, %c0_2] : memref<128x512xbf16, #tpu.memory_space<vmem>>, vector<128x512xbf16>
    %cst = arith.constant dense<0.000000e+00> : vector<16x512xf32>
    %2 = tpu.matmul %0, %1, %cst {dimension_numbers = #tpu.dot_dimension_numbers<[1], [0], [0], [1], [0, 0, 1, 1], [], []>} : vector<16x128xbf16>, vector<128x512xbf16>, vector<16x512xf32> -> vector<16x512xf32>
    %c0_3 = arith.constant 0 : index
    %c0_4 = arith.constant 0 : index
    %3 = vector.load %arg3[%c0_3, %c0_4] : memref<1x512xf32, #tpu.memory_space<vmem>>, vector<1x512xf32>
    %4 = vector.broadcast %3 : vector<1x512xf32> to vector<16x512xf32>
    %5 = arith.addf %2, %4 : vector<16x512xf32>
    %cst_5 = arith.constant 0.000000e+00 : f32
    %6 = vector.broadcast %cst_5 : f32 to vector<16x512xf32>
    %7 = arith.maximumf %5, %6 : vector<16x512xf32>
    %8 = arith.truncf %7 : vector<16x512xf32> to vector<16x512xbf16>
    %c0_6 = arith.constant 0 : index
    %c0_7 = arith.constant 0 : index
    %9 = vector.load %arg4[%c0_6, %c0_7] : memref<512x128xbf16, #tpu.memory_space<vmem>>, vector<512x128xbf16>
    %cst_8 = arith.constant dense<0.000000e+00> : vector<16x128xf32>
    %10 = tpu.matmul %8, %9, %cst_8 {dimension_numbers = #tpu.dot_dimension_numbers<[1], [0], [0], [1], [0, 0, 1, 1], [], []>} : vector<16x512xbf16>, vector<512x128xbf16>, vector<16x128xf32> -> vector<16x128xf32>
    %c0_9 = arith.constant 0 : index
    %c0_10 = arith.constant 0 : index
    %11 = vector.load %arg5[%c0_9, %c0_10] : memref<1x128xf32, #tpu.memory_space<vmem>>, vector<1x128xf32>
    %12 = vector.broadcast %11 : vector<1x128xf32> to vector<16x128xf32>
    %13 = arith.addf %10, %12 : vector<16x128xf32>
    %c0_11 = arith.constant 0 : index
    %c0_12 = arith.constant 0 : index
    %14 = vector.load %arg6[%c0_11, %c0_12] : memref<16x128xf32, #tpu.memory_space<vmem>>, vector<16x128xf32>
    tpu.vector_store %arg6[%c0_11, %c0_12], %13 {strides = array<i32>} : memref<16x128xf32, #tpu.memory_space<vmem>>, vector<16x128xf32>,
    return
  }
  func.func @transform_0(%arg0: i32) -> (i32, i32) {
    %c0_i32 = arith.constant 0 : i32
    %c0_i32_0 = arith.constant 0 : i32
    return %arg0, %c0_i32 : i32, i32
  }
  func.func @transform_1(%arg0: i32) -> (i32, i32) {
    %c0_i32 = arith.constant 0 : i32
    %c0_i32_0 = arith.constant 0 : i32
    %c0_i32_1 = arith.constant 0 : i32
    return %c0_i32, %c0_i32_0 : i32, i32
  }
  func.func @transform_2(%arg0: i32) -> (i32, i32) {
    %c0_i32 = arith.constant 0 : i32
    %c0_i32_0 = arith.constant 0 : i32
    %c0_i32_1 = arith.constant 0 : i32
    return %c0_i32, %c0_i32_0 : i32, i32
  }
  func.func @transform_3(%arg0: i32) -> (i32, i32) {
    %c0_i32 = arith.constant 0 : i32
    %c0_i32_0 = arith.constant 0 : i32
    %c0_i32_1 = arith.constant 0 : i32
    return %c0_i32, %c0_i32_0 : i32, i32
  }
  func.func @transform_4(%arg0: i32) -> (i32, i32) {
    %c0_i32 = arith.constant 0 : i32
    %c0_i32_0 = arith.constant 0 : i32
    %c0_i32_1 = arith.constant 0 : i32
    return %c0_i32, %c0_i32_0 : i32, i32
  }
  func.func @transform_5(%arg0: i32) -> (i32, i32) {
    %c0_i32 = arith.constant 0 : i32
    %c0_i32_0 = arith.constant 0 : i32
    return %arg0, %c0_i32 : i32, i32
  }
}

</mosaic_0001>

<bundles_post_ra>
// kernel: tpu_custom_call.1
= control target key start
LH: loop header
LB: loop body
LE: loop exit
PB: predicated region body
PF: predicated region fallthrough
CT: control target
= control target key end

     0   :  { %10 = vsyncpa [#allocation3], 0  ;;  %s1223_s0 = inlined_call_operand.hbm [shape: bf16[16,128], index: 0, kind: input, shape index: {}]   ;;  %s1224_s1 = inlined_call_operand.hbm [shape: bf16[128,512], index: 1, kind: input, shape index: {}]   ;;  %s1225_s2 = inlined_call_operand.hbm [shape: f32[1,512], index: 2, kind: input, shape index: {}]   ;;  %s1226_s3 = inlined_call_operand.hbm [shape: bf16[512,128], index: 3, kind: input, shape index: {}]   ;;  %s1227_s4 = inlined_call_operand.vmem [shape: f32[1,128], index: 4, kind: input, shape index: {}]   ;;  %s1228_s5 = inlined_call_operand.hbm [shape: f32[16,128], index: 5, kind: output, shape index: {}]  }
   0x1   :  { %11 = vsyncpa [#allocation6], 0 }
   0x2   :  { %12 = vsyncpa [#allocation9], 0  ;;  %s31_s20 = sshll.u32 %s1224_s1, 4  ;;  %s32_s20 = int_to_ptr.hbm [resolvable:$true] %s31_s20 }
   0x3   :  { %13 = vsyncpa [#allocation4], 0  ;;  %s1164_s21 = smov [#allocation5]   ;;  %s18_s25 = sshll.u32 %s1223_s0, 4  ;;  %s19_s25 = int_to_ptr.hbm [resolvable:$true] %s18_s25 }
   0x4   :  { %s33_s22 = sshll.u32 %s1164_s21, 4  ;;  %s1165_s26 = smov 256   ;;  %s34_s22 = int_to_ptr.vmem [resolvable:$true] %s33_s22 }
   0x5   :  { %s1166_s27 = smov 16   ;;  %s1167_s28 = smov [#allocation2]  }
   0x6   :  { %39 = dma.hbm_to_vmem [thread:$0]  %s32_s20, 4096, %s34_s22, [#allocation6], %s1165_s26, %s1165_s26, %s1166_s27  }
   0x7   :  { %s20_s29 = sshll.u32 %s1167_s28, 4  ;;  %s1168_s30 = smov 64   ;;  %s21_s29 = int_to_ptr.vmem [resolvable:$true] %s20_s29 }
   0x8   :  { %s1169_s6 = smov 4   ;;  %s45_s8 = sshll.u32 %s1225_s2, 4  ;;  %s46_s8 = int_to_ptr.hbm [resolvable:$true] %s45_s8 }
   0x9   :  { %26 = dma.hbm_to_vmem [thread:$0]  %s19_s25, 128, %s21_s29, [#allocation3], %s1168_s30, %s1168_s30, %s1169_s6  }
   0xa   :  { %s1170_s9 = smov [#allocation7]   ;;  %s55_s12 = sshll.u32 %s1226_s3, 4  ;;  %s56_s12 = int_to_ptr.hbm [resolvable:$true] %s55_s12 }
   0xb   :  { %s47_s10 = sshll.u32 %s1170_s9, 4  ;;  %s1171_s13 = smov [#allocation8]   ;;  %s48_s10 = int_to_ptr.vmem [resolvable:$true] %s47_s10 }
   0xc   :  { %50 = dma.hbm_to_vmem [thread:$0]  %s46_s8, 64, %s48_s10, [#allocation6]  }
   0xd   :  { %s57_s14 = sshll.u32 %s1171_s13, 4  ;;  %s58_s14 = int_to_ptr.vmem [resolvable:$true] %s57_s14 }
   0xe   :  { %63 = dma.hbm_to_vmem [thread:$0]  %s56_s12, 4096, %s58_s14, [#allocation9], %s1168_s30, %s1168_s30, %s1169_s6  }
   0xf   :  { %1156 = dma.done.wait [#allocation3], 128  }
  0x10   :  { %1157 = vsyncadd [#allocation3], 4294967168 }
  0x11   :  { %1158 = dma.done.wait [#allocation6], 4160  }
  0x12   :  { %1159 = vsyncadd [#allocation6], 4294963136 }
  0x13   :  { %1160 = dma.done.wait [#allocation9], 4096  }
  0x14   :  { %1161 = vsyncadd [#allocation9], 4294963200  ;;  %v817_v0 = vld [vmem:[#allocation5 + $0xe0] sm:$0xf]  ;;  %v990_v1 = vld [vmem:[#allocation5 + $0xec] sm:$0xf0] }
  0x15   :  { %v988_v2 = vld [vmem:[#allocation5 + $0xe4] sm:$0xf]  ;;  %v818_v3 = vor.u32 %v990_v1, %v817_v0  ;;  %v819_v4 = vld [vmem:[#allocation5 + $0xf0] sm:$0xf0]  ;;  %v825_v5 = vld [vmem:[#allocation5 + $0xe8] sm:$0xf] }
  0x16   :  { %v991_v6 = vld [vmem:[#allocation5 + $0xf4] sm:$0xf0]  ;;  %v822_v7 = vor.u32 %v988_v2, %v819_v4  ;;  %v989_v9 = vld [vmem:[#allocation5 + $0xec] sm:$0xf]  ;;  %v827_v10 = vld [vmem:[#allocation5 + $0xf8] sm:$0xf0] }
  0x17   :  { %v826_v8 = vor.u32 %v991_v6, %v825_v5  ;;  %v801_v11 = vld [vmem:[#allocation5 + $0xc0] sm:$0xf]  ;;  %292 = vmatpush.bf16.msra.mxu0 %v818_v3  ;;  %v830_v12 = vor.u32 %v989_v9, %v827_v10  ;;  %v986_v13 = vld [vmem:[#allocation5 + $0xcc] sm:$0xf0]  ;;  %v984_v14 = vld [vmem:[#allocation5 + $0xc4] sm:$0xf] }
  0x18   :  { %v803_v15 = vld [vmem:[#allocation5 + $0xd0] sm:$0xf0]  ;;  %306 = vmatpush.bf16.msra.mxu1 %v822_v7  ;;  %v802_v16 = vor.u32 %v986_v13, %v801_v11  ;;  %v809_v18 = vld [vmem:[#allocation5 + $0xc8] sm:$0xf]  ;;  %v987_v19 = vld [vmem:[#allocation5 + $0xd4] sm:$0xf0] }
  0x19   :  { %320 = vmatpush.bf16.msra.mxu2 %v826_v8  ;;  %v806_v17 = vor.u32 %v984_v14, %v803_v15  ;;  %v985_v20 = vld [vmem:[#allocation5 + $0xcc] sm:$0xf]  ;;  %334 = vmatpush.bf16.msra.mxu3 %v830_v12  ;;  %v810_v21 = vor.u32 %v987_v19, %v809_v18  ;;  %v811_v22 = vld [vmem:[#allocation5 + $0xd8] sm:$0xf0]  ;;  %v785_v23 = vld [vmem:[#allocation5 + $0xa0] sm:$0xf] }
  0x1a   :  { %v982_v24 = vld [vmem:[#allocation5 + $0xac] sm:$0xf0]  ;;  %v814_v25 = vor.u32 %v985_v20, %v811_v22  ;;  %v980_v26 = vld [vmem:[#allocation5 + $0xa4] sm:$0xf]  ;;  %v787_v27 = vld [vmem:[#allocation5 + $0xb0] sm:$0xf0] }
  0x1b   :  { %v793_v28 = vld [vmem:[#allocation5 + $0xa8] sm:$0xf]  ;;  %293 = vmatpush.bf16.msra.mxu0 %v802_v16  ;;  %v786_v29 = vor.u32 %v982_v24, %v785_v23  ;;  %v983_v30 = vld [vmem:[#allocation5 + $0xb4] sm:$0xf0]  ;;  %v981_v31 = vld [vmem:[#allocation5 + $0xac] sm:$0xf]  ;;  %v790_v33 = vor.u32 %v980_v26, %v787_v27 }
  0x1c   :  { %v795_v32 = vld [vmem:[#allocation5 + $0xb8] sm:$0xf0]  ;;  %307 = vmatpush.bf16.msra.mxu1 %v806_v17  ;;  %v794_v34 = vor.u32 %v983_v30, %v793_v28  ;;  %v769_v35 = vld [vmem:[#allocation5 + $0x80] sm:$0xf]  ;;  %v978_v36 = vld [vmem:[#allocation5 + $0x8c] sm:$0xf0] }
  0x1d   :  { %321 = vmatpush.bf16.msra.mxu2 %v810_v21  ;;  %v976_v37 = vld [vmem:[#allocation5 + $0x84] sm:$0xf]  ;;  %335 = vmatpush.bf16.msra.mxu3 %v814_v25  ;;  %v798_v38 = vor.u32 %v981_v31, %v795_v32  ;;  %v771_v39 = vld [vmem:[#allocation5 + $0x90] sm:$0xf0]  ;;  %v777_v40 = vld [vmem:[#allocation5 + $0x88] sm:$0xf]  ;;  %v770_v44 = vor.u32 %v978_v36, %v769_v35 }
  0x1e   :  { %v979_v41 = vld [vmem:[#allocation5 + $0x94] sm:$0xf0]  ;;  %v977_v42 = vld [vmem:[#allocation5 + $0x8c] sm:$0xf]  ;;  %v779_v43 = vld [vmem:[#allocation5 + $0x98] sm:$0xf0]  ;;  %v774_v45 = vor.u32 %v976_v37, %v771_v39 }
  0x1f   :  { %294 = vmatpush.bf16.msra.mxu0 %v786_v29  ;;  %v778_v46 = vor.u32 %v979_v41, %v777_v40  ;;  %v753_v47 = vld [vmem:[#allocation5 + $0x60] sm:$0xf]  ;;  %v974_v48 = vld [vmem:[#allocation5 + $0x6c] sm:$0xf0]  ;;  %v972_v49 = vld [vmem:[#allocation5 + $0x64] sm:$0xf]  ;;  %v782_v50 = vor.u32 %v977_v42, %v779_v43 }
  0x20   :  { %308 = vmatpush.bf16.msra.mxu1 %v790_v33  ;;  %v755_v51 = vld [vmem:[#allocation5 + $0x70] sm:$0xf0]  ;;  %v761_v52 = vld [vmem:[#allocation5 + $0x68] sm:$0xf]  ;;  %v975_v53 = vld [vmem:[#allocation5 + $0x74] sm:$0xf0]  ;;  %v754_v56 = vor.u32 %v974_v48, %v753_v47 }
  0x21   :  { %322 = vmatpush.bf16.msra.mxu2 %v794_v34  ;;  %336 = vmatpush.bf16.msra.mxu3 %v798_v38  ;;  %v973_v54 = vld [vmem:[#allocation5 + $0x6c] sm:$0xf]  ;;  %v763_v55 = vld [vmem:[#allocation5 + $0x78] sm:$0xf0]  ;;  %v758_v57 = vor.u32 %v972_v49, %v755_v51  ;;  %v762_v58 = vor.u32 %v975_v53, %v761_v52  ;;  %v737_v59 = vld [vmem:[#allocation5 + $0x40] sm:$0xf] }
  0x22   :  { %v970_v60 = vld [vmem:[#allocation5 + $0x4c] sm:$0xf0]  ;;  %v968_v61 = vld [vmem:[#allocation5 + $0x44] sm:$0xf]  ;;  %v766_v62 = vor.u32 %v973_v54, %v763_v55  ;;  %v739_v63 = vld [vmem:[#allocation5 + $0x50] sm:$0xf0] }
  0x23   :  { %295 = vmatpush.bf16.msra.mxu0 %v770_v44  ;;  %v745_v0 = vld [vmem:[#allocation5 + $0x48] sm:$0xf]  ;;  %v971_v1 = vld [vmem:[#allocation5 + $0x54] sm:$0xf0]  ;;  %v969_v2 = vld [vmem:[#allocation5 + $0x4c] sm:$0xf]  ;;  %v738_v4 = vor.u32 %v970_v60, %v737_v59  ;;  %v742_v5 = vor.u32 %v968_v61, %v739_v63 }
  0x24   :  { %309 = vmatpush.bf16.msra.mxu1 %v774_v45  ;;  %v747_v3 = vld [vmem:[#allocation5 + $0x58] sm:$0xf0]  ;;  %v746_v6 = vor.u32 %v971_v1, %v745_v0  ;;  %v721_v7 = vld [vmem:[#allocation5 + $0x20] sm:$0xf]  ;;  %v966_v8 = vld [vmem:[#allocation5 + $0x2c] sm:$0xf0] }
  0x25   :  { %323 = vmatpush.bf16.msra.mxu2 %v778_v46  ;;  %337 = vmatpush.bf16.msra.mxu3 %v782_v50  ;;  %v964_v9 = vld [vmem:[#allocation5 + $0x24] sm:$0xf]  ;;  %v750_v10 = vor.u32 %v969_v2, %v747_v3  ;;  %v723_v11 = vld [vmem:[#allocation5 + $0x30] sm:$0xf0]  ;;  %v729_v12 = vld [vmem:[#allocation5 + $0x28] sm:$0xf]  ;;  %v722_v16 = vor.u32 %v966_v8, %v721_v7 }
  0x26   :  { %v967_v13 = vld [vmem:[#allocation5 + $0x34] sm:$0xf0]  ;;  %v965_v14 = vld [vmem:[#allocation5 + $0x2c] sm:$0xf]  ;;  %v731_v15 = vld [vmem:[#allocation5 + $0x38] sm:$0xf0]  ;;  %v726_v17 = vor.u32 %v964_v9, %v723_v11 }
  0x27   :  { %296 = vmatpush.bf16.msra.mxu0 %v754_v56  ;;  %v730_v18 = vor.u32 %v967_v13, %v729_v12  ;;  %v705_v19 = vld [vmem:[#allocation5] sm:$0xf]  ;;  %v962_v20 = vld [vmem:[#allocation5 + $0xc] sm:$0xf0]  ;;  %v960_v21 = vld [vmem:[#allocation5 + $0x4] sm:$0xf]  ;;  %v734_v22 = vor.u32 %v965_v14, %v731_v15 }
  0x28   :  { %310 = vmatpush.bf16.msra.mxu1 %v758_v57  ;;  %v707_v23 = vld [vmem:[#allocation5 + $0x10] sm:$0xf0]  ;;  %v713_v24 = vld [vmem:[#allocation5 + $0x8] sm:$0xf]  ;;  %v963_v25 = vld [vmem:[#allocation5 + $0x14] sm:$0xf0]  ;;  %v706_v28 = vor.u32 %v962_v20, %v705_v19 }
  0x29   :  { %324 = vmatpush.bf16.msra.mxu2 %v762_v58  ;;  %338 = vmatpush.bf16.msra.mxu3 %v766_v62  ;;  %v961_v26 = vld [vmem:[#allocation5 + $0xc] sm:$0xf]  ;;  %v715_v27 = vld [vmem:[#allocation5 + $0x18] sm:$0xf0]  ;;  %v710_v29 = vor.u32 %v960_v21, %v707_v23  ;;  %v714_v30 = vor.u32 %v963_v25, %v713_v24  ;;  %v998_v36 = vld [vmem:[#allocation8 + $0x30] sm:$0xff]  ;;  %s1172_s15 = smov [#allocation10]  }
  0x2a   :  { %v718_v31 = vor.u32 %v961_v26, %v715_v27  ;;  %v999_v32 = vld [vmem:[#allocation8 + $0x38] sm:$0xff]  ;;  %v1006_v38 = vld [vmem:[#allocation8 + $0x70] sm:$0xff]  ;;  %v997_v40 = vld [vmem:[#allocation8 + $0x28] sm:$0xff]  ;;  %s682_s16 = sshll.u32 %s1172_s15, 4  ;;  %s684_s19 = sshll.u32 %s1228_s5, 4  ;;  %s683_s16 = int_to_ptr.vmem [resolvable:$true] %s682_s16  ;;  %s685_s19 = int_to_ptr.hbm [resolvable:$true] %s684_s19 }
  0x2b   :  { %297 = vmatpush.bf16.msra.mxu0 %v738_v4  ;;  %v959_v33 = vld [vmem:[#allocation2] sm:$0xff]  ;;  %v1005_v42 = vld [vmem:[#allocation8 + $0x68] sm:$0xff]  ;;  %v996_v44 = vld [vmem:[#allocation8 + $0x20] sm:$0xff]  ;;  %s1174_s20 = smov 8  }
  0x2c   :  { %311 = vmatpush.bf16.msra.mxu1 %v742_v5  ;;  %v1007_v34 = vld [vmem:[#allocation8 + $0x78] sm:$0xff]  ;;  %v1014_v39 = vld [vmem:[#allocation8 + $0xb0] sm:$0xff]  ;;  %v1013_v43 = vld [vmem:[#allocation8 + $0xa8] sm:$0xff] }
  0x2d   :  { %325 = vmatpush.bf16.msra.mxu2 %v746_v6  ;;  %339 = vmatpush.bf16.msra.mxu3 %v750_v10  ;;  %v1015_v35 = vld [vmem:[#allocation8 + $0xb8] sm:$0xff]  ;;  %v1022_v41 = vld [vmem:[#allocation8 + $0xf0] sm:$0xff]  ;;  %v1021_v45 = vld [vmem:[#allocation8 + $0xe8] sm:$0xff] }
  0x2e   :  { %v1023_v37 = vld [vmem:[#allocation8 + $0xf8] sm:$0xff]  ;;  %v1004_v46 = vld [vmem:[#allocation8 + $0x60] sm:$0xff]  ;;  %v994_v51 = vld [vmem:[#allocation8 + $0x10] sm:$0xff] }
  0x2f   :  { %298 = vmatpush.bf16.msra.mxu0 %v722_v16  ;;  %v995_v47 = vld [vmem:[#allocation8 + $0x18] sm:$0xff]  ;;  %v1012_v49 = vld [vmem:[#allocation8 + $0xa0] sm:$0xff]  ;;  %v1002_v52 = vld [vmem:[#allocation8 + $0x50] sm:$0xff] }
  0x30   :  { %312 = vmatpush.bf16.msra.mxu1 %v726_v17  ;;  %v1003_v48 = vld [vmem:[#allocation8 + $0x58] sm:$0xff]  ;;  %v1020_v50 = vld [vmem:[#allocation8 + $0xe0] sm:$0xff]  ;;  %v993_v55 = vld [vmem:[#allocation8 + $0x8] sm:$0xff] }
  0x31   :  { %326 = vmatpush.bf16.msra.mxu2 %v730_v18  ;;  %340 = vmatpush.bf16.msra.mxu3 %v734_v22  ;;  %v1011_v53 = vld [vmem:[#allocation8 + $0x98] sm:$0xff]  ;;  %v1001_v56 = vld [vmem:[#allocation8 + $0x48] sm:$0xff]  ;;  %v1010_v57 = vld [vmem:[#allocation8 + $0x90] sm:$0xff] }
  0x32   :  { %v1019_v54 = vld [vmem:[#allocation8 + $0xd8] sm:$0xff]  ;;  %v1018_v58 = vld [vmem:[#allocation8 + $0xd0] sm:$0xff]  ;;  %v992_v59 = vld [vmem:[#allocation8] sm:$0xff] }
  0x33   :  { %299 = vmatpush.bf16.msra.mxu0 %v706_v28  ;;  %v1000_v60 = vld [vmem:[#allocation8 + $0x40] sm:$0xff]  ;;  %v1009_v61 = vld [vmem:[#allocation8 + $0x88] sm:$0xff]  ;;  %v116_v1 = vld [vmem:[#allocation7] sm:$0xf] }
  0x34   :  { %313 = vmatpush.bf16.msra.mxu1 %v710_v29  ;;  %v1017_v62 = vld [vmem:[#allocation8 + $0xc8] sm:$0xff]  ;;  %v1008_v63 = vld [vmem:[#allocation8 + $0x80] sm:$0xff]  ;;  %v118_v3 = vperm.slane %v116_v1, 0  ;;  %v119_v5 = vperm.slane %v116_v1, 1  ;;  %v120_v15 = vperm.slane %v116_v1, 2  ;;  %v121_v17 = vperm.slane %v116_v1, 3 }
  0x35   :  { %327 = vmatpush.bf16.msra.mxu2 %v714_v30  ;;  %341 = vmatpush.bf16.msra.mxu3 %v718_v31  ;;  %v1016_v0 = vld [vmem:[#allocation8 + $0xc0] sm:$0xff] }
  0x36   :  { %300 = vmatmul.bf16.vlgmr.msra.gmra.mxu0 %v959_v33 }
  0x37   :  { %620 = vmatpush.bf16.msrb.mxu0 %v999_v32  ;;  %314 = vmatmul.bf16.vlgmr.msra.gmra.mxu1 %v959_v33 }
  0x38   :  { %634 = vmatpush.bf16.msrb.mxu1 %v1007_v34  ;;  %328 = vmatmul.bf16.vlgmr.msra.gmra.mxu2 %v959_v33 }
  0x39   :  { %342 = vmatmul.bf16.vlgmr.msra.gmra.mxu3 %v959_v33  ;;  %648 = vmatpush.bf16.msrb.mxu2 %v1015_v35  ;;  %v1035_v35 = vld [vmem:[%s1227_s4] ss:$0 sm:$0xff]  ;;  %s1173_s4 = smov 128  }
  0x3a   :  { %662 = vmatpush.bf16.msrb.mxu3 %v1023_v37 }
  0x3b   :  { %621 = vmatpush.bf16.msrb.mxu0 %v998_v36 }
  0x3c   :  { %635 = vmatpush.bf16.msrb.mxu1 %v1006_v38 }
  0x3d   :  { %649 = vmatpush.bf16.msrb.mxu2 %v1014_v39 }
  0x3e   :  { %663 = vmatpush.bf16.msrb.mxu3 %v1022_v41 }
  0x3f   :  { %622 = vmatpush.bf16.msrb.mxu0 %v997_v40 }
  0x40   :  { %636 = vmatpush.bf16.msrb.mxu1 %v1005_v42 }
  0x41   :  { %650 = vmatpush.bf16.msrb.mxu2 %v1013_v43 }
  0x42   :  { %664 = vmatpush.bf16.msrb.mxu3 %v1021_v45 }
  0x43   :  { %623 = vmatpush.bf16.msrb.mxu0 %v996_v44 }
  0x44   :  { %637 = vmatpush.bf16.msrb.mxu1 %v1004_v46 }
  0x45   :  { %651 = vmatpush.bf16.msrb.mxu2 %v1012_v49 }
  0x46   :  { %665 = vmatpush.bf16.msrb.mxu3 %v1020_v50 }
  0x47   :  { %624 = vmatpush.bf16.msrb.mxu0 %v995_v47 }
  0x48   :  { %638 = vmatpush.bf16.msrb.mxu1 %v1003_v48 }
  0x49   :  { %652 = vmatpush.bf16.msrb.mxu2 %v1011_v53 }
  0x4a   :  { %666 = vmatpush.bf16.msrb.mxu3 %v1019_v54 }
  0x4b   :  { %625 = vmatpush.bf16.msrb.mxu0 %v994_v51 }
  0x4c   :  { %639 = vmatpush.bf16.msrb.mxu1 %v1002_v52 }
  0x4d   :  { %653 = vmatpush.bf16.msrb.mxu2 %v1010_v57 }
  0x4e   :  { %667 = vmatpush.bf16.msrb.mxu3 %v1018_v58 }
  0x4f   :  { %626 = vmatpush.bf16.msrb.mxu0 %v993_v55 }
  0x50   :  { %640 = vmatpush.bf16.msrb.mxu1 %v1001_v56 }
  0x51   :  { %654 = vmatpush.bf16.msrb.mxu2 %v1009_v61 }
  0x52   :  { %668 = vmatpush.bf16.msrb.mxu3 %v1017_v62 }
  0x53   :  { %627 = vmatpush.bf16.msrb.mxu0 %v992_v59 }
  0x54   :  { %641 = vmatpush.bf16.msrb.mxu1 %v1000_v60 }
  0x55   :  { %655 = vmatpush.bf16.msrb.mxu2 %v1008_v63 }
  0x56   :  { %669 = vmatpush.bf16.msrb.mxu3 %v1016_v0 }
  0xb3   :  { %v301_v2 = vpop.f32.mrf.mxu0 }
  0xb4   :  { %v315_v4 = vpop.f32.mrf.mxu1  ;;  %v302_v6 = vadd.f32 %v301_v2, %v118_v3 }
  0xb5   :  { %v316_v7 = vadd.f32 %v315_v4, %v119_v5 }
  0xb6   :  { %v348_v11 = vmax.f32 %v302_v6, 0.0 }
  0xb7   :  { %v349_v14 = vmax.f32 %v316_v7, 0.0 }
  0xbb   :  { %v329_v8 = vpop.f32.mrf.mxu2  ;;  %v303_v10 = vpop.f32.mrf.mxu0 }
  0xbc   :  { %v343_v9 = vpop.f32.mrf.mxu3  ;;  %v304_v12 = vadd.f32 %v303_v10, %v118_v3  ;;  %v317_v13 = vpop.f32.mrf.mxu1  ;;  %v330_v21 = vadd.f32 %v329_v8, %v120_v15 }
  0xbd   :  { %v318_v16 = vadd.f32 %v317_v13, %v119_v5  ;;  %v344_v23 = vadd.f32 %v343_v9, %v121_v17 }
  0xbe   :  { %v352_v18 = vmax.f32 %v304_v12, 0.0  ;;  %v350_v28 = vmax.f32 %v330_v21, 0.0 }
  0xbf   :  { %v353_v19 = vmax.f32 %v318_v16, 0.0  ;;  %v351_v30 = vmax.f32 %v344_v23, 0.0 }
  0xc0   :  { %v356_v20 = vpack.c.bf16 %v352_v18, %v348_v11 }
  0xc1   :  { %v357_v22 = vpack.c.bf16 %v353_v19, %v349_v14 }
  0xc2   :  { %628 = vmatmul.bf16.vlgmr.msrb.gmra.mxu0 %v356_v20 }
  0xc3   :  { %v331_v24 = vpop.f32.mrf.mxu2  ;;  %642 = vmatmul.bf16.vlgmr.msrb.gmra.mxu1 %v357_v22 }
  0xc4   :  { %v332_v25 = vadd.f32 %v331_v24, %v120_v15  ;;  %v345_v26 = vpop.f32.mrf.mxu3 }
  0xc5   :  { %v346_v27 = vadd.f32 %v345_v26, %v121_v17 }
  0xc6   :  { %v354_v29 = vmax.f32 %v332_v25, 0.0 }
  0xc7   :  { %v355_v31 = vmax.f32 %v346_v27, 0.0 }
  0xc8   :  { %v358_v32 = vpack.c.bf16 %v354_v29, %v350_v28 }
  0xc9   :  { %v359_v33 = vpack.c.bf16 %v355_v31, %v351_v30 }
  0xca   :  { %656 = vmatmul.bf16.vlgmr.msrb.gmra.mxu2 %v358_v32 }
  0xcb   :  { %670 = vmatmul.bf16.vlgmr.msrb.gmra.mxu3 %v359_v33 }
 0x13f   :  { %v629_v34 = vpop.f32.mrf.mxu0 }
 0x140   :  { %v630_v36 = vadd.f32 %v1035_v35, %v629_v34  ;;  %v643_v37 = vpop.f32.mrf.mxu1 }
 0x142   :  { %v644_v38 = vadd.f32 %v643_v37, %v630_v36 }
 0x147   :  { %v631_v39 = vpop.f32.mrf.mxu0 }
 0x148   :  { %v632_v43 = vadd.f32 %v1035_v35, %v631_v39  ;;  %v645_v45 = vpop.f32.mrf.mxu1 }
 0x14a   :  { %v646_v46 = vadd.f32 %v645_v45, %v632_v43 }
 0x14d   :  { %v657_v40 = vpop.f32.mrf.mxu2 }
 0x14e   :  { %v658_v41 = vadd.f32 %v657_v40, %v644_v38  ;;  %v671_v42 = vpop.f32.mrf.mxu3 }
 0x150   :  { %v672_v44 = vadd.f32 %v671_v42, %v658_v41 }
 0x152   :  { %676 = vst [vmem:[#allocation10] sm:$0xff] %v672_v44 }
 0x155   :  { %v659_v47 = vpop.f32.mrf.mxu2 }
 0x156   :  { %v660_v48 = vadd.f32 %v659_v47, %v646_v46  ;;  %v673_v49 = vpop.f32.mrf.mxu3 }
 0x158   :  { %v674_v50 = vadd.f32 %v673_v49, %v660_v48 }
 0x15a   :  { %677 = vst [vmem:[#allocation10 + $0x8] sm:$0xff] %v674_v50 }
 0x15b   :  { %690 = dma.vmem_to_hbm [thread:$0]  %s683_s16, 256, %s685_s19, [#allocation4], %s1173_s4, %s1173_s4, %s1174_s20  }
 0x15c   :  { %1162 = dma.done.wait [#allocation4], 256  }
 0x15d   :  { %1163 = vsyncadd [#allocation4], 4294967040 }
 0x15e   :  { %695 = vsyncpa [#allocation3], 1 }
 0x15f   :  { %696 = vsyncpa [#allocation6], 1 }
 0x160   :  { %697 = vsyncpa [#allocation9], 1 }
 0x161   :  { %698 = vsyncpa [#allocation4], 1 }

// kernel: tpu_custom_call.1
= control target key start
LH: loop header
LB: loop body
LE: loop exit
PB: predicated region body
PF: predicated region fallthrough
CT: control target
= control target key end

     0   :  { %10 = vsyncpa [#allocation3], 0  ;;  %s1223_s0 = inlined_call_operand.hbm [shape: bf16[16,128], index: 0, kind: input, shape index: {}]   ;;  %s1224_s1 = inlined_call_operand.hbm [shape: bf16[128,512], index: 1, kind: input, shape index: {}]   ;;  %s1225_s2 = inlined_call_operand.hbm [shape: f32[1,512], index: 2, kind: input, shape index: {}]   ;;  %s1226_s3 = inlined_call_operand.hbm [shape: bf16[512,128], index: 3, kind: input, shape index: {}]   ;;  %s1227_s4 = inlined_call_operand.vmem [shape: f32[1,128], index: 4, kind: input, shape index: {}]   ;;  %s1228_s5 = inlined_call_operand.hbm [shape: f32[16,128], index: 5, kind: output, shape index: {}]  }
   0x1   :  { %11 = vsyncpa [#allocation6], 0 }
   0x2   :  { %12 = vsyncpa [#allocation9], 0  ;;  %s31_s20 = sshll.u32 %s1224_s1, 4  ;;  %s32_s20 = int_to_ptr.hbm [resolvable:$true] %s31_s20 }
   0x3   :  { %13 = vsyncpa [#allocation4], 0  ;;  %s1164_s21 = smov [#allocation5]   ;;  %s18_s25 = sshll.u32 %s1223_s0, 4  ;;  %s19_s25 = int_to_ptr.hbm [resolvable:$true] %s18_s25 }
   0x4   :  { %s33_s22 = sshll.u32 %s1164_s21, 4  ;;  %s1165_s26 = smov 256   ;;  %s34_s22 = int_to_ptr.vmem [resolvable:$true] %s33_s22 }
   0x5   :  { %s1166_s27 = smov 16   ;;  %s1167_s28 = smov [#allocation2]  }
   0x6   :  { %39 = dma.hbm_to_vmem [thread:$0]  %s32_s20, 4096, %s34_s22, [#allocation6], %s1165_s26, %s1165_s26, %s1166_s27  }
   0x7   :  { %s20_s29 = sshll.u32 %s1167_s28, 4  ;;  %s1168_s30 = smov 64   ;;  %s21_s29 = int_to_ptr.vmem [resolvable:$true] %s20_s29 }
   0x8   :  { %s1169_s6 = smov 4   ;;  %s45_s8 = sshll.u32 %s1225_s2, 4  ;;  %s46_s8 = int_to_ptr.hbm [resolvable:$true] %s45_s8 }
   0x9   :  { %26 = dma.hbm_to_vmem [thread:$0]  %s19_s25, 128, %s21_s29, [#allocation3], %s1168_s30, %s1168_s30, %s1169_s6  }
   0xa   :  { %s1170_s9 = smov [#allocation7]   ;;  %s55_s12 = sshll.u32 %s1226_s3, 4  ;;  %s56_s12 = int_to_ptr.hbm [resolvable:$true] %s55_s12 }
   0xb   :  { %s47_s10 = sshll.u32 %s1170_s9, 4  ;;  %s1171_s13 = smov [#allocation8]   ;;  %s48_s10 = int_to_ptr.vmem [resolvable:$true] %s47_s10 }
   0xc   :  { %50 = dma.hbm_to_vmem [thread:$0]  %s46_s8, 64, %s48_s10, [#allocation6]  }
   0xd   :  { %s57_s14 = sshll.u32 %s1171_s13, 4  ;;  %s58_s14 = int_to_ptr.vmem [resolvable:$true] %s57_s14 }
   0xe   :  { %63 = dma.hbm_to_vmem [thread:$0]  %s56_s12, 4096, %s58_s14, [#allocation9], %s1168_s30, %s1168_s30, %s1169_s6  }
   0xf   :  { %1156 = dma.done.wait [#allocation3], 128  }
  0x10   :  { %1157 = vsyncadd [#allocation3], 4294967168 }
  0x11   :  { %1158 = dma.done.wait [#allocation6], 4160  }
  0x12   :  { %1159 = vsyncadd [#allocation6], 4294963136 }
  0x13   :  { %1160 = dma.done.wait [#allocation9], 4096  }
  0x14   :  { %1161 = vsyncadd [#allocation9], 4294963200  ;;  %v817_v0 = vld [vmem:[#allocation5 + $0xe0] sm:$0xf]  ;;  %v990_v1 = vld [vmem:[#allocation5 + $0xec] sm:$0xf0] }
  0x15   :  { %v988_v2 = vld [vmem:[#allocation5 + $0xe4] sm:$0xf]  ;;  %v818_v3 = vor.u32 %v990_v1, %v817_v0  ;;  %v819_v4 = vld [vmem:[#allocation5 + $0xf0] sm:$0xf0]  ;;  %v825_v5 = vld [vmem:[#allocation5 + $0xe8] sm:$0xf] }
  0x16   :  { %v991_v6 = vld [vmem:[#allocation5 + $0xf4] sm:$0xf0]  ;;  %v822_v7 = vor.u32 %v988_v2, %v819_v4  ;;  %v989_v9 = vld [vmem:[#allocation5 + $0xec] sm:$0xf]  ;;  %v827_v10 = vld [vmem:[#allocation5 + $0xf8] sm:$0xf0] }
  0x17   :  { %v826_v8 = vor.u32 %v991_v6, %v825_v5  ;;  %v801_v11 = vld [vmem:[#allocation5 + $0xc0] sm:$0xf]  ;;  %292 = vmatpush.bf16.msra.mxu0 %v818_v3  ;;  %v830_v12 = vor.u32 %v989_v9, %v827_v10  ;;  %v986_v13 = vld [vmem:[#allocation5 + $0xcc] sm:$0xf0]  ;;  %v984_v14 = vld [vmem:[#allocation5 + $0xc4] sm:$0xf] }
  0x18   :  { %v803_v15 = vld [vmem:[#allocation5 + $0xd0] sm:$0xf0]  ;;  %306 = vmatpush.bf16.msra.mxu1 %v822_v7  ;;  %v802_v16 = vor.u32 %v986_v13, %v801_v11  ;;  %v809_v18 = vld [vmem:[#allocation5 + $0xc8] sm:$0xf]  ;;  %v987_v19 = vld [vmem:[#allocation5 + $0xd4] sm:$0xf0] }
  0x19   :  { %320 = vmatpush.bf16.msra.mxu2 %v826_v8  ;;  %v806_v17 = vor.u32 %v984_v14, %v803_v15  ;;  %v985_v20 = vld [vmem:[#allocation5 + $0xcc] sm:$0xf]  ;;  %334 = vmatpush.bf16.msra.mxu3 %v830_v12  ;;  %v810_v21 = vor.u32 %v987_v19, %v809_v18  ;;  %v811_v22 = vld [vmem:[#allocation5 + $0xd8] sm:$0xf0]  ;;  %v785_v23 = vld [vmem:[#allocation5 + $0xa0] sm:$0xf] }
  0x1a   :  { %v982_v24 = vld [vmem:[#allocation5 + $0xac] sm:$0xf0]  ;;  %v814_v25 = vor.u32 %v985_v20, %v811_v22  ;;  %v980_v26 = vld [vmem:[#allocation5 + $0xa4] sm:$0xf]  ;;  %v787_v27 = vld [vmem:[#allocation5 + $0xb0] sm:$0xf0] }
  0x1b   :  { %v793_v28 = vld [vmem:[#allocation5 + $0xa8] sm:$0xf]  ;;  %293 = vmatpush.bf16.msra.mxu0 %v802_v16  ;;  %v786_v29 = vor.u32 %v982_v24, %v785_v23  ;;  %v983_v30 = vld [vmem:[#allocation5 + $0xb4] sm:$0xf0]  ;;  %v981_v31 = vld [vmem:[#allocation5 + $0xac] sm:$0xf]  ;;  %v790_v33 = vor.u32 %v980_v26, %v787_v27 }
  0x1c   :  { %v795_v32 = vld [vmem:[#allocation5 + $0xb8] sm:$0xf0]  ;;  %307 = vmatpush.bf16.msra.mxu1 %v806_v17  ;;  %v794_v34 = vor.u32 %v983_v30, %v793_v28  ;;  %v769_v35 = vld [vmem:[#allocation5 + $0x80] sm:$0xf]  ;;  %v978_v36 = vld [vmem:[#allocation5 + $0x8c] sm:$0xf0] }
  0x1d   :  { %321 = vmatpush.bf16.msra.mxu2 %v810_v21  ;;  %v976_v37 = vld [vmem:[#allocation5 + $0x84] sm:$0xf]  ;;  %335 = vmatpush.bf16.msra.mxu3 %v814_v25  ;;  %v798_v38 = vor.u32 %v981_v31, %v795_v32  ;;  %v771_v39 = vld [vmem:[#allocation5 + $0x90] sm:$0xf0]  ;;  %v777_v40 = vld [vmem:[#allocation5 + $0x88] sm:$0xf]  ;;  %v770_v44 = vor.u32 %v978_v36, %v769_v35 }
  0x1e   :  { %v979_v41 = vld [vmem:[#allocation5 + $0x94] sm:$0xf0]  ;;  %v977_v42 = vld [vmem:[#allocation5 + $0x8c] sm:$0xf]  ;;  %v779_v43 = vld [vmem:[#allocation5 + $0x98] sm:$0xf0]  ;;  %v774_v45 = vor.u32 %v976_v37, %v771_v39 }
  0x1f   :  { %294 = vmatpush.bf16.msra.mxu0 %v786_v29  ;;  %v778_v46 = vor.u32 %v979_v41, %v777_v40  ;;  %v753_v47 = vld [vmem:[#allocation5 + $0x60] sm:$0xf]  ;;  %v974_v48 = vld [vmem:[#allocation5 + $0x6c] sm:$0xf0]  ;;  %v972_v49 = vld [vmem:[#allocation5 + $0x64] sm:$0xf]  ;;  %v782_v50 = vor.u32 %v977_v42, %v779_v43 }
  0x20   :  { %308 = vmatpush.bf16.msra.mxu1 %v790_v33  ;;  %v755_v51 = vld [vmem:[#allocation5 + $0x70] sm:$0xf0]  ;;  %v761_v52 = vld [vmem:[#allocation5 + $0x68] sm:$0xf]  ;;  %v975_v53 = vld [vmem:[#allocation5 + $0x74] sm:$0xf0]  ;;  %v754_v56 = vor.u32 %v974_v48, %v753_v47 }
  0x21   :  { %322 = vmatpush.bf16.msra.mxu2 %v794_v34  ;;  %336 = vmatpush.bf16.msra.mxu3 %v798_v38  ;;  %v973_v54 = vld [vmem:[#allocation5 + $0x6c] sm:$0xf]  ;;  %v763_v55 = vld [vmem:[#allocation5 + $0x78] sm:$0xf0]  ;;  %v758_v57 = vor.u32 %v972_v49, %v755_v51  ;;  %v762_v58 = vor.u32 %v975_v53, %v761_v52  ;;  %v737_v59 = vld [vmem:[#allocation5 + $0x40] sm:$0xf] }
  0x22   :  { %v970_v60 = vld [vmem:[#allocation5 + $0x4c] sm:$0xf0]  ;;  %v968_v61 = vld [vmem:[#allocation5 + $0x44] sm:$0xf]  ;;  %v766_v62 = vor.u32 %v973_v54, %v763_v55  ;;  %v739_v63 = vld [vmem:[#allocation5 + $0x50] sm:$0xf0] }
  0x23   :  { %295 = vmatpush.bf16.msra.mxu0 %v770_v44  ;;  %v745_v0 = vld [vmem:[#allocation5 + $0x48] sm:$0xf]  ;;  %v971_v1 = vld [vmem:[#allocation5 + $0x54] sm:$0xf0]  ;;  %v969_v2 = vld [vmem:[#allocation5 + $0x4c] sm:$0xf]  ;;  %v738_v4 = vor.u32 %v970_v60, %v737_v59  ;;  %v742_v5 = vor.u32 %v968_v61, %v739_v63 }
  0x24   :  { %309 = vmatpush.bf16.msra.mxu1 %v774_v45  ;;  %v747_v3 = vld [vmem:[#allocation5 + $0x58] sm:$0xf0]  ;;  %v746_v6 = vor.u32 %v971_v1, %v745_v0  ;;  %v721_v7 = vld [vmem:[#allocation5 + $0x20] sm:$0xf]  ;;  %v966_v8 = vld [vmem:[#allocation5 + $0x2c] sm:$0xf0] }
  0x25   :  { %323 = vmatpush.bf16.msra.mxu2 %v778_v46  ;;  %337 = vmatpush.bf16.msra.mxu3 %v782_v50  ;;  %v964_v9 = vld [vmem:[#allocation5 + $0x24] sm:$0xf]  ;;  %v750_v10 = vor.u32 %v969_v2, %v747_v3  ;;  %v723_v11 = vld [vmem:[#allocation5 + $0x30] sm:$0xf0]  ;;  %v729_v12 = vld [vmem:[#allocation5 + $0x28] sm:$0xf]  ;;  %v722_v16 = vor.u32 %v966_v8, %v721_v7 }
  0x26   :  { %v967_v13 = vld [vmem:[#allocation5 + $0x34] sm:$0xf0]  ;;  %v965_v14 = vld [vmem:[#allocation5 + $0x2c] sm:$0xf]  ;;  %v731_v15 = vld [vmem:[#allocation5 + $0x38] sm:$0xf0]  ;;  %v726_v17 = vor.u32 %v964_v9, %v723_v11 }
  0x27   :  { %296 = vmatpush.bf16.msra.mxu0 %v754_v56  ;;  %v730_v18 = vor.u32 %v967_v13, %v729_v12  ;;  %v705_v19 = vld [vmem:[#allocation5] sm:$0xf]  ;;  %v962_v20 = vld [vmem:[#allocation5 + $0xc] sm:$0xf0]  ;;  %v960_v21 = vld [vmem:[#allocation5 + $0x4] sm:$0xf]  ;;  %v734_v22 = vor.u32 %v965_v14, %v731_v15 }
  0x28   :  { %310 = vmatpush.bf16.msra.mxu1 %v758_v57  ;;  %v707_v23 = vld [vmem:[#allocation5 + $0x10] sm:$0xf0]  ;;  %v713_v24 = vld [vmem:[#allocation5 + $0x8] sm:$0xf]  ;;  %v963_v25 = vld [vmem:[#allocation5 + $0x14] sm:$0xf0]  ;;  %v706_v28 = vor.u32 %v962_v20, %v705_v19 }
  0x29   :  { %324 = vmatpush.bf16.msra.mxu2 %v762_v58  ;;  %338 = vmatpush.bf16.msra.mxu3 %v766_v62  ;;  %v961_v26 = vld [vmem:[#allocation5 + $0xc] sm:$0xf]  ;;  %v715_v27 = vld [vmem:[#allocation5 + $0x18] sm:$0xf0]  ;;  %v710_v29 = vor.u32 %v960_v21, %v707_v23  ;;  %v714_v30 = vor.u32 %v963_v25, %v713_v24  ;;  %v998_v36 = vld [vmem:[#allocation8 + $0x30] sm:$0xff]  ;;  %s1172_s15 = smov [#allocation10]  }
  0x2a   :  { %v718_v31 = vor.u32 %v961_v26, %v715_v27  ;;  %v999_v32 = vld [vmem:[#allocation8 + $0x38] sm:$0xff]  ;;  %v1006_v38 = vld [vmem:[#allocation8 + $0x70] sm:$0xff]  ;;  %v997_v40 = vld [vmem:[#allocation8 + $0x28] sm:$0xff]  ;;  %s682_s16 = sshll.u32 %s1172_s15, 4  ;;  %s684_s19 = sshll.u32 %s1228_s5, 4  ;;  %s683_s16 = int_to_ptr.vmem [resolvable:$true] %s682_s16  ;;  %s685_s19 = int_to_ptr.hbm [resolvable:$true] %s684_s19 }
  0x2b   :  { %297 = vmatpush.bf16.msra.mxu0 %v738_v4  ;;  %v959_v33 = vld [vmem:[#allocation2] sm:$0xff]  ;;  %v1005_v42 = vld [vmem:[#allocation8 + $0x68] sm:$0xff]  ;;  %v996_v44 = vld [vmem:[#allocation8 + $0x20] sm:$0xff]  ;;  %s1174_s20 = smov 8  }
  0x2c   :  { %311 = vmatpush.bf16.msra.mxu1 %v742_v5  ;;  %v1007_v34 = vld [vmem:[#allocation8 + $0x78] sm:$0xff]  ;;  %v1014_v39 = vld [vmem:[#allocation8 + $0xb0] sm:$0xff]  ;;  %v1013_v43 = vld [vmem:[#allocation8 + $0xa8] sm:$0xff] }
  0x2d   :  { %325 = vmatpush.bf16.msra.mxu2 %v746_v6  ;;  %339 = vmatpush.bf16.msra.mxu3 %v750_v10  ;;  %v1015_v35 = vld [vmem:[#allocation8 + $0xb8] sm:$0xff]  ;;  %v1022_v41 = vld [vmem:[#allocation8 + $0xf0] sm:$0xff]  ;;  %v1021_v45 = vld [vmem:[#allocation8 + $0xe8] sm:$0xff] }
  0x2e   :  { %v1023_v37 = vld [vmem:[#allocation8 + $0xf8] sm:$0xff]  ;;  %v1004_v46 = vld [vmem:[#allocation8 + $0x60] sm:$0xff]  ;;  %v994_v51 = vld [vmem:[#allocation8 + $0x10] sm:$0xff] }
  0x2f   :  { %298 = vmatpush.bf16.msra.mxu0 %v722_v16  ;;  %v995_v47 = vld [vmem:[#allocation8 + $0x18] sm:$0xff]  ;;  %v1012_v49 = vld [vmem:[#allocation8 + $0xa0] sm:$0xff]  ;;  %v1002_v52 = vld [vmem:[#allocation8 + $0x50] sm:$0xff] }
  0x30   :  { %312 = vmatpush.bf16.msra.mxu1 %v726_v17  ;;  %v1003_v48 = vld [vmem:[#allocation8 + $0x58] sm:$0xff]  ;;  %v1020_v50 = vld [vmem:[#allocation8 + $0xe0] sm:$0xff]  ;;  %v993_v55 = vld [vmem:[#allocation8 + $0x8] sm:$0xff] }
  0x31   :  { %326 = vmatpush.bf16.msra.mxu2 %v730_v18  ;;  %340 = vmatpush.bf16.msra.mxu3 %v734_v22  ;;  %v1011_v53 = vld [vmem:[#allocation8 + $0x98] sm:$0xff]  ;;  %v1001_v56 = vld [vmem:[#allocation8 + $0x48] sm:$0xff]  ;;  %v1010_v57 = vld [vmem:[#allocation8 + $0x90] sm:$0xff] }
  0x32   :  { %v1019_v54 = vld [vmem:[#allocation8 + $0xd8] sm:$0xff]  ;;  %v1018_v58 = vld [vmem:[#allocation8 + $0xd0] sm:$0xff]  ;;  %v992_v59 = vld [vmem:[#allocation8] sm:$0xff] }
  0x33   :  { %299 = vmatpush.bf16.msra.mxu0 %v706_v28  ;;  %v1000_v60 = vld [vmem:[#allocation8 + $0x40] sm:$0xff]  ;;  %v1009_v61 = vld [vmem:[#allocation8 + $0x88] sm:$0xff]  ;;  %v116_v1 = vld [vmem:[#allocation7] sm:$0xf] }
  0x34   :  { %313 = vmatpush.bf16.msra.mxu1 %v710_v29  ;;  %v1017_v62 = vld [vmem:[#allocation8 + $0xc8] sm:$0xff]  ;;  %v1008_v63 = vld [vmem:[#allocation8 + $0x80] sm:$0xff]  ;;  %v118_v3 = vperm.slane %v116_v1, 0  ;;  %v119_v5 = vperm.slane %v116_v1, 1  ;;  %v120_v15 = vperm.slane %v116_v1, 2  ;;  %v121_v17 = vperm.slane %v116_v1, 3 }
  0x35   :  { %327 = vmatpush.bf16.msra.mxu2 %v714_v30  ;;  %341 = vmatpush.bf16.msra.mxu3 %v718_v31  ;;  %v1016_v0 = vld [vmem:[#allocation8 + $0xc0] sm:$0xff] }
  0x36   :  { %300 = vmatmul.bf16.vlgmr.msra.gmra.mxu0 %v959_v33 }
  0x37   :  { %620 = vmatpush.bf16.msrb.mxu0 %v999_v32  ;;  %314 = vmatmul.bf16.vlgmr.msra.gmra.mxu1 %v959_v33 }
  0x38   :  { %634 = vmatpush.bf16.msrb.mxu1 %v1007_v34  ;;  %328 = vmatmul.bf16.vlgmr.msra.gmra.mxu2 %v959_v33 }
  0x39   :  { %342 = vmatmul.bf16.vlgmr.msra.gmra.mxu3 %v959_v33  ;;  %648 = vmatpush.bf16.msrb.mxu2 %v1015_v35  ;;  %v1035_v35 = vld [vmem:[%s1227_s4] ss:$0 sm:$0xff]  ;;  %s1173_s4 = smov 128  }
  0x3a   :  { %662 = vmatpush.bf16.msrb.mxu3 %v1023_v37 }
  0x3b   :  { %621 = vmatpush.bf16.msrb.mxu0 %v998_v36 }
  0x3c   :  { %635 = vmatpush.bf16.msrb.mxu1 %v1006_v38 }
  0x3d   :  { %649 = vmatpush.bf16.msrb.mxu2 %v1014_v39 }
  0x3e   :  { %663 = vmatpush.bf16.msrb.mxu3 %v1022_v41 }
  0x3f   :  { %622 = vmatpush.bf16.msrb.mxu0 %v997_v40 }
  0x40   :  { %636 = vmatpush.bf16.msrb.mxu1 %v1005_v42 }
  0x41   :  { %650 = vmatpush.bf16.msrb.mxu2 %v1013_v43 }
  0x42   :  { %664 = vmatpush.bf16.msrb.mxu3 %v1021_v45 }
  0x43   :  { %623 = vmatpush.bf16.msrb.mxu0 %v996_v44 }
  0x44   :  { %637 = vmatpush.bf16.msrb.mxu1 %v1004_v46 }
  0x45   :  { %651 = vmatpush.bf16.msrb.mxu2 %v1012_v49 }
  0x46   :  { %665 = vmatpush.bf16.msrb.mxu3 %v1020_v50 }
  0x47   :  { %624 = vmatpush.bf16.msrb.mxu0 %v995_v47 }
  0x48   :  { %638 = vmatpush.bf16.msrb.mxu1 %v1003_v48 }
  0x49   :  { %652 = vmatpush.bf16.msrb.mxu2 %v1011_v53 }
  0x4a   :  { %666 = vmatpush.bf16.msrb.mxu3 %v1019_v54 }
  0x4b   :  { %625 = vmatpush.bf16.msrb.mxu0 %v994_v51 }
  0x4c   :  { %639 = vmatpush.bf16.msrb.mxu1 %v1002_v52 }
  0x4d   :  { %653 = vmatpush.bf16.msrb.mxu2 %v1010_v57 }
  0x4e   :  { %667 = vmatpush.bf16.msrb.mxu3 %v1018_v58 }
  0x4f   :  { %626 = vmatpush.bf16.msrb.mxu0 %v993_v55 }
  0x50   :  { %640 = vmatpush.bf16.msrb.mxu1 %v1001_v56 }
  0x51   :  { %654 = vmatpush.bf16.msrb.mxu2 %v1009_v61 }
  0x52   :  { %668 = vmatpush.bf16.msrb.mxu3 %v1017_v62 }
  0x53   :  { %627 = vmatpush.bf16.msrb.mxu0 %v992_v59 }
  0x54   :  { %641 = vmatpush.bf16.msrb.mxu1 %v1000_v60 }
  0x55   :  { %655 = vmatpush.bf16.msrb.mxu2 %v1008_v63 }
  0x56   :  { %669 = vmatpush.bf16.msrb.mxu3 %v1016_v0 }
  0xb3   :  { %v301_v2 = vpop.f32.mrf.mxu0 }
  0xb4   :  { %v315_v4 = vpop.f32.mrf.mxu1  ;;  %v302_v6 = vadd.f32 %v301_v2, %v118_v3 }
  0xb5   :  { %v316_v7 = vadd.f32 %v315_v4, %v119_v5 }
  0xb6   :  { %v348_v11 = vmax.f32 %v302_v6, 0.0 }
  0xb7   :  { %v349_v14 = vmax.f32 %v316_v7, 0.0 }
  0xbb   :  { %v329_v8 = vpop.f32.mrf.mxu2  ;;  %v303_v10 = vpop.f32.mrf.mxu0 }
  0xbc   :  { %v343_v9 = vpop.f32.mrf.mxu3  ;;  %v304_v12 = vadd.f32 %v303_v10, %v118_v3  ;;  %v317_v13 = vpop.f32.mrf.mxu1  ;;  %v330_v21 = vadd.f32 %v329_v8, %v120_v15 }
  0xbd   :  { %v318_v16 = vadd.f32 %v317_v13, %v119_v5  ;;  %v344_v23 = vadd.f32 %v343_v9, %v121_v17 }
  0xbe   :  { %v352_v18 = vmax.f32 %v304_v12, 0.0  ;;  %v350_v28 = vmax.f32 %v330_v21, 0.0 }
  0xbf   :  { %v353_v19 = vmax.f32 %v318_v16, 0.0  ;;  %v351_v30 = vmax.f32 %v344_v23, 0.0 }
  0xc0   :  { %v356_v20 = vpack.c.bf16 %v352_v18, %v348_v11 }
  0xc1   :  { %v357_v22 = vpack.c.bf16 %v353_v19, %v349_v14 }
  0xc2   :  { %628 = vmatmul.bf16.vlgmr.msrb.gmra.mxu0 %v356_v20 }
  0xc3   :  { %v331_v24 = vpop.f32.mrf.mxu2  ;;  %642 = vmatmul.bf16.vlgmr.msrb.gmra.mxu1 %v357_v22 }
  0xc4   :  { %v332_v25 = vadd.f32 %v331_v24, %v120_v15  ;;  %v345_v26 = vpop.f32.mrf.mxu3 }
  0xc5   :  { %v346_v27 = vadd.f32 %v345_v26, %v121_v17 }
  0xc6   :  { %v354_v29 = vmax.f32 %v332_v25, 0.0 }
  0xc7   :  { %v355_v31 = vmax.f32 %v346_v27, 0.0 }
  0xc8   :  { %v358_v32 = vpack.c.bf16 %v354_v29, %v350_v28 }
  0xc9   :  { %v359_v33 = vpack.c.bf16 %v355_v31, %v351_v30 }
  0xca   :  { %656 = vmatmul.bf16.vlgmr.msrb.gmra.mxu2 %v358_v32 }
  0xcb   :  { %670 = vmatmul.bf16.vlgmr.msrb.gmra.mxu3 %v359_v33 }
 0x13f   :  { %v629_v34 = vpop.f32.mrf.mxu0 }
 0x140   :  { %v630_v36 = vadd.f32 %v1035_v35, %v629_v34  ;;  %v643_v37 = vpop.f32.mrf.mxu1 }
 0x142   :  { %v644_v38 = vadd.f32 %v643_v37, %v630_v36 }
 0x147   :  { %v631_v39 = vpop.f32.mrf.mxu0 }
 0x148   :  { %v632_v43 = vadd.f32 %v1035_v35, %v631_v39  ;;  %v645_v45 = vpop.f32.mrf.mxu1 }
 0x14a   :  { %v646_v46 = vadd.f32 %v645_v45, %v632_v43 }
 0x14d   :  { %v657_v40 = vpop.f32.mrf.mxu2 }
 0x14e   :  { %v658_v41 = vadd.f32 %v657_v40, %v644_v38  ;;  %v671_v42 = vpop.f32.mrf.mxu3 }
 0x150   :  { %v672_v44 = vadd.f32 %v671_v42, %v658_v41 }
 0x152   :  { %676 = vst [vmem:[#allocation10] sm:$0xff] %v672_v44 }
 0x155   :  { %v659_v47 = vpop.f32.mrf.mxu2 }
 0x156   :  { %v660_v48 = vadd.f32 %v659_v47, %v646_v46  ;;  %v673_v49 = vpop.f32.mrf.mxu3 }
 0x158   :  { %v674_v50 = vadd.f32 %v673_v49, %v660_v48 }
 0x15a   :  { %677 = vst [vmem:[#allocation10 + $0x8] sm:$0xff] %v674_v50 }
 0x15b   :  { %690 = dma.vmem_to_hbm [thread:$0]  %s683_s16, 256, %s685_s19, [#allocation4], %s1173_s4, %s1173_s4, %s1174_s20  }
 0x15c   :  { %1162 = dma.done.wait [#allocation4], 256  }
 0x15d   :  { %1163 = vsyncadd [#allocation4], 4294967040 }
 0x15e   :  { %695 = vsyncpa [#allocation3], 1 }
 0x15f   :  { %696 = vsyncpa [#allocation6], 1 }
 0x160   :  { %697 = vsyncpa [#allocation9], 1 }
 0x161   :  { %698 = vsyncpa [#allocation4], 1 }

</bundles_post_ra>
